<compile_context>
chip_gen: v7x
topology: tpu7x:2x2x1
jax: 0.10.0
libtpu: 0.0.40
codegen_flags: <defaults>
</compile_context>

<pallas_src>
import functools

import jax
import jax.numpy as jnp
from jax import lax
from jax.experimental import pallas as pl
from jax.experimental.pallas import tpu as pltpu

BN_EPS = 1e-5
_LANE = 128
_SUBLANE = 8


def _round_up(n, m):
    return ((n + m - 1) // m) * m


def _pad2d(a, rows, cols):
    r, c = a.shape
    if r == rows and c == cols:
        return a
    return jnp.pad(a, ((0, rows - r), (0, cols - c)))


# --------------------------------------------------------------- pass 1 -----
def _fc1_stats_kernel(x_ref, w1_ref, b1_ref, h_ref, stats_ref, *, tb, b_actual):
    """h = tanh(x @ w1 + b1); masked per-tile sum / sum_sq for BatchNorm."""
    h = jnp.dot(x_ref[...], w1_ref[...],
                preferred_element_type=jnp.float32) + b1_ref[...]
    h = jnp.tanh(h)                                              # f32 (EUP)

    # Exclude zero-padded batch rows from the statistics.
    row = pl.program_id(0) * tb + lax.broadcasted_iota(jnp.int32, (tb, 1), 0)
    valid = (row < b_actual).astype(jnp.float32)                 # [tb, 1]
    hm = h * valid
    s = jnp.sum(hm, axis=0, keepdims=True)                       # [1, Hp]
    ss = jnp.sum(hm * hm, axis=0, keepdims=True)                 # [1, Hp]
    stats_ref[...] = jnp.concatenate([s, ss], axis=0).reshape(stats_ref.shape)

    h_ref[...] = h.astype(h_ref.dtype)


# --------------------------------------------------------------- pass 2 -----
def _fc2_kernel(h_ref, w2_ref, b2_ref, y_ref):
    y = jnp.dot(h_ref[...], w2_ref[...],
                preferred_element_type=jnp.float32) + b2_ref[...]
    y_ref[...] = y.astype(y_ref.dtype)


# --------------------------------------------------------------- wrapper ----
def mlp_gcn_forward(x, params, *, block_rows=512, compute_dtype=jnp.bfloat16):
    """x: [B, n_feature] f32 -> [B, n_output] f32 (PyTorch MLP_gcn forward)."""
    w1, b1, gamma, beta, w2, b2 = params
    B, F = x.shape
    H = w1.shape[1]
    O = w2.shape[1]

    Hp = _round_up(H, _LANE)                 # lane-dense hidden dim
    Op = _round_up(O, _LANE)                 # lane-dense output dim

    tb = min(_round_up(block_rows, _SUBLANE), _round_up(B, _SUBLANE))
    b_pad = _round_up(B, tb)
    nb = b_pad // tb
    itm = jnp.dtype(compute_dtype).itemsize

    # Zero-pad parameters (keeps the math exact; padded columns stay zero).
    w1p = _pad2d(w1, F, Hp)
    b1p = _pad2d(b1.reshape(1, -1), 1, Hp)
    gammap = _pad2d(gamma.reshape(1, -1), 1, Hp)
    betap = _pad2d(beta.reshape(1, -1), 1, Hp)
    w2p = _pad2d(w2, Hp, Op)
    b2p = _pad2d(b2.reshape(1, -1), 1, Op)

    xp = _pad2d(x, b_pad, F).astype(compute_dtype)   # MXU operand dtype
    w1c = w1p.astype(compute_dtype)

    cparams = pltpu.CompilerParams(
        dimension_semantics=("parallel",),
        vmem_limit_bytes=32 * 1024 * 1024,   # safe on v5e/v6e and v7x (64 MiB phys)
    )

    # ---- pass 1: fc1 + tanh + per-tile BN statistics ------------------------
    cost1 = pl.CostEstimate(
        flops=2 * b_pad * F * Hp + 6 * b_pad * Hp,
        transcendentals=b_pad * Hp,
        bytes_accessed=(xp.size * itm + w1c.size * itm + b1p.size * 4
                        + b_pad * Hp * itm + nb * 2 * Hp * 4),
    )
    h, stats = pl.pallas_call(
        functools.partial(_fc1_stats_kernel, tb=tb, b_actual=B),
        grid=(nb,),
        in_specs=[
            pl.BlockSpec((tb, F), lambda i: (i, 0)),        # x tile
            pl.BlockSpec((F, Hp), lambda i: (0, 0)),        # w1 (resident)
            pl.BlockSpec((1, Hp), lambda i: (0, 0)),        # b1 (resident)
        ],
        out_specs=[
            pl.BlockSpec((tb, Hp), lambda i: (i, 0)),       # h tile
            pl.BlockSpec((1, 2, Hp), lambda i: (i, 0, 0)),  # per-tile stats
        ],
        out_shape=[
            jax.ShapeDtypeStruct((b_pad, Hp), compute_dtype),
            jax.ShapeDtypeStruct((nb, 2, Hp), jnp.float32),
        ],
        compiler_params=cparams,
        cost_estimate=cost1,
    )(xp, w1c, b1p)

    # ---- tiny [H]-sized reduction + BN folding (plain JAX, f32) -------------
    total = jnp.sum(stats, axis=0)                           # [2, Hp]
    mean = total[0] / B                                      # [Hp]
    var = jnp.maximum(total[1] / B - mean * mean, 0.0)       # biased (training BN)
    scale = gammap[0] * lax.rsqrt(var + BN_EPS)              # [Hp]
    shift = betap[0] - mean * scale                          # [Hp]

    # y = (h*scale + shift) @ w2 + b2 = h @ (scale[:,None]*w2) + (shift@w2 + b2)
    w2_eff = (scale[:, None] * w2p).astype(compute_dtype)    # [Hp, Op]
    b2_eff = (shift[None, :] @ w2p + b2p).astype(jnp.float32)  # [1, Op]

    # ---- pass 2: fused-BN fc23 ----------------------------------------------
    cost2 = pl.CostEstimate(
        flops=2 * b_pad * Hp * Op,
        transcendentals=0,
        bytes_accessed=(b_pad * Hp * itm + w2_eff.size * itm
                        + b2_eff.size * 4 + b_pad * Op * 4),
    )
    y = pl.pallas_call(
        _fc2_kernel,
        grid=(nb,),
        in_specs=[
            pl.BlockSpec((tb, Hp), lambda i: (i, 0)),       # h tile
            pl.BlockSpec((Hp, Op), lambda i: (0, 0)),       # w2_eff (resident)
            pl.BlockSpec((1, Op), lambda i: (0, 0)),        # b2_eff (resident)
        ],
        out_specs=pl.BlockSpec((tb, Op), lambda i: (i, 0)),
        out_shape=jax.ShapeDtypeStruct((b_pad, Op), jnp.float32),
        compiler_params=cparams,
        cost_estimate=cost2,
    )(h, w2_eff, b2_eff)

    return y[:B, :O]


# --------------------------------------------------------------- helpers ----
def init_params(key, n_feature, n_hidden, n_output):
    """Deterministic PyTorch-Linear-style uniform init; weights stored [in, out]."""
    k1, k2, k3, k4 = jax.random.split(key, 4)
    bound1 = 1.0 / jnp.sqrt(jnp.float32(n_feature))
    bound2 = 1.0 / jnp.sqrt(jnp.float32(n_hidden))
    w1 = jax.random.uniform(k1, (n_feature, n_hidden), jnp.float32, -bound1, bound1)
    b1 = jax.random.uniform(k2, (1, n_hidden), jnp.float32, -bound1, bound1)
    gamma = jnp.ones((1, n_hidden), jnp.float32)
    beta = jnp.zeros((1, n_hidden), jnp.float32)
    w2 = jax.random.uniform(k3, (n_hidden, n_output), jnp.float32, -bound2, bound2)
    b2 = jax.random.uniform(k4, (1, n_output), jnp.float32, -bound2, bound2)
    return (w1, b1, gamma, beta, w2, b2)


def mlp_gcn_ref(x, params):
    """Pure-JAX f32 reference."""
    w1, b1, gamma, beta, w2, b2 = params
    h = jnp.tanh(x @ w1 + b1)
    mean = jnp.mean(h, axis=0, keepdims=True)
    var = jnp.mean((h - mean) ** 2, axis=0, keepdims=True)
    h = (h - mean) / jnp.sqrt(var + BN_EPS)
    h = h * gamma + beta
    return h @ w2 + b2


if __name__ == "__main__":
    n_feature, n_hidden, n_output = 16, 32, 8

    key = jax.random.PRNGKey(0)
    kx1, kx2, kp = jax.random.split(key, 3)
    params = init_params(kp, n_feature, n_hidden, n_output)

    # Check 1: f32 MXU operands, single tile — tight tolerance vs reference.
    x1 = jax.random.normal(kx1, (8, n_feature), jnp.float32)
    out1 = jax.block_until_ready(
        mlp_gcn_forward(x1, params, compute_dtype=jnp.float32))
    ref1 = mlp_gcn_ref(x1, params)
    assert out1.shape == (8, n_output)
    assert jnp.allclose(out1, ref1, atol=1e-4, rtol=1e-4), "f32 mismatch vs reference"

    # Check 2: bf16 MXU operands, ragged batch (13 rows) with 8-row tiles —
    # exercises the multi-tile grid and the padded-row masking in the BN stats.
    x2 = jax.random.normal(kx2, (13, n_feature), jnp.float32)
    out2 = jax.block_until_ready(
        mlp_gcn_forward(x2, params, block_rows=8, compute_dtype=jnp.bfloat16))
    ref2 = mlp_gcn_ref(x2, params)
    assert out2.shape == (13, n_output)
    assert jnp.allclose(out2, ref2, atol=5e-2, rtol=5e-2), "bf16 mismatch vs reference"

    print("KERNEL_OK")
</pallas_src>

<mosaic_0001>
module attributes {stable_mosaic.version = 11 : i64} {
  func.func @_fc1_stats_kernel(%arg0: i32, %arg1: memref<8x16xf32, #tpu.memory_space<vmem>>, %arg2: memref<16x128xf32, #tpu.memory_space<vmem>>, %arg3: memref<1x128xf32, #tpu.memory_space<vmem>>, %arg4: memref<8x128xf32, #tpu.memory_space<vmem>>, %arg5: memref<1x2x128xf32, #tpu.memory_space<vmem>>) attributes {dimension_semantics = [#tpu.dimension_semantics<parallel>], iteration_bounds = array<i64: 1>, scalar_prefetch = 0 : i64, scratch_operands = 0 : i64, tpu.core_type = #tpu.core_type<tc>, window_params = [{transform_indices = @transform_0, window_bounds = array<i64: 8, 16>}, {pipeline_mode = #tpu.pipeline_mode<synchronous>, transform_indices = @transform_1, window_bounds = array<i64: 16, 128>}, {pipeline_mode = #tpu.pipeline_mode<synchronous>, transform_indices = @transform_2, window_bounds = array<i64: 1, 128>}, {transform_indices = @transform_3, window_bounds = array<i64: 8, 128>}, {transform_indices = @transform_4, window_bounds = array<i64: 1, 2, 128>}]} {
    %c0 = arith.constant 0 : index
    %c0_0 = arith.constant 0 : index
    %0 = vector.load %arg1[%c0, %c0_0] : memref<8x16xf32, #tpu.memory_space<vmem>>, vector<8x16xf32>
    %c0_1 = arith.constant 0 : index
    %c0_2 = arith.constant 0 : index
    %1 = vector.load %arg2[%c0_1, %c0_2] : memref<16x128xf32, #tpu.memory_space<vmem>>, vector<16x128xf32>
    %cst = arith.constant dense<0.000000e+00> : vector<8x128xf32>
    %2 = tpu.matmul %0, %1, %cst {dimension_numbers = #tpu.dot_dimension_numbers<[1], [0], [0], [1], [0, 0, 1, 1], [], []>} : vector<8x16xf32>, vector<16x128xf32>, vector<8x128xf32> -> vector<8x128xf32>
    %c0_3 = arith.constant 0 : index
    %c0_4 = arith.constant 0 : index
    %3 = vector.load %arg3[%c0_3, %c0_4] : memref<1x128xf32, #tpu.memory_space<vmem>>, vector<1x128xf32>
    %4 = vector.broadcast %3 : vector<1x128xf32> to vector<8x128xf32>
    %5 = arith.addf %2, %4 : vector<8x128xf32>
    %6 = math.tanh %5 : vector<8x128xf32>
    %c8_i32 = arith.constant 8 : i32
    %7 = arith.muli %arg0, %c8_i32 : i32
    %8 = tpu.iota {dimensions = array<i32: 0>} : vector<8x1xi32>
    %9 = vector.broadcast %7 : i32 to vector<8x1xi32>
    %10 = arith.addi %9, %8 : vector<8x1xi32>
    %c8_i32_5 = arith.constant 8 : i32
    %11 = vector.broadcast %c8_i32_5 : i32 to vector<8x1xi32>
    %12 = arith.cmpi slt, %10, %11 : vector<8x1xi32>
    %13 = arith.extui %12 : vector<8x1xi1> to vector<8x1xi32>
    %14 = arith.sitofp %13 : vector<8x1xi32> to vector<8x1xf32>
    %15 = vector.broadcast %14 : vector<8x1xf32> to vector<8x128xf32>
    %16 = arith.mulf %6, %15 : vector<8x128xf32>
    %cst_6 = arith.constant dense<0.000000e+00> : vector<128xf32>
    %17 = vector.multi_reduction <add>, %16, %cst_6 [0] : vector<8x128xf32> to vector<128xf32>
    %18 = vector.shape_cast %17 : vector<128xf32> to vector<1x128xf32>
    %19 = arith.mulf %16, %16 : vector<8x128xf32>
    %cst_7 = arith.constant dense<0.000000e+00> : vector<128xf32>
    %20 = vector.multi_reduction <add>, %19, %cst_7 [0] : vector<8x128xf32> to vector<128xf32>
    %21 = vector.shape_cast %20 : vector<128xf32> to vector<1x128xf32>
    %22 = tpu.concatenate %18, %21 in 0 : vector<1x128xf32>, vector<1x128xf32> -> vector<2x128xf32>
    %23 = vector.shape_cast %22 : vector<2x128xf32> to vector<1x2x128xf32>
    %c0_8 = arith.constant 0 : index
    %c0_9 = arith.constant 0 : index
    %c0_10 = arith.constant 0 : index
    %24 = vector.load %arg5[%c0_8, %c0_9, %c0_10] : memref<1x2x128xf32, #tpu.memory_space<vmem>>, vector<1x2x128xf32>
    tpu.vector_store %arg5[%c0_8, %c0_9, %c0_10], %23 {strides = array<i32>} : memref<1x2x128xf32, #tpu.memory_space<vmem>>, vector<1x2x128xf32>,
    %c0_11 = arith.constant 0 : index
    %c0_12 = arith.constant 0 : index
    %25 = vector.load %arg4[%c0_11, %c0_12] : memref<8x128xf32, #tpu.memory_space<vmem>>, vector<8x128xf32>
    tpu.vector_store %arg4[%c0_11, %c0_12], %6 {strides = array<i32>} : memref<8x128xf32, #tpu.memory_space<vmem>>, vector<8x128xf32>,
    return
  }
  func.func @transform_0(%arg0: i32) -> (i32, i32) {
    %c0_i32 = arith.constant 0 : i32
    %c0_i32_0 = arith.constant 0 : i32
    return %arg0, %c0_i32 : i32, i32
  }
  func.func @transform_1(%arg0: i32) -> (i32, i32) {
    %c0_i32 = arith.constant 0 : i32
    %c0_i32_0 = arith.constant 0 : i32
    %c0_i32_1 = arith.constant 0 : i32
    return %c0_i32, %c0_i32_0 : i32, i32
  }
  func.func @transform_2(%arg0: i32) -> (i32, i32) {
    %c0_i32 = arith.constant 0 : i32
    %c0_i32_0 = arith.constant 0 : i32
    %c0_i32_1 = arith.constant 0 : i32
    return %c0_i32, %c0_i32_0 : i32, i32
  }
  func.func @transform_3(%arg0: i32) -> (i32, i32) {
    %c0_i32 = arith.constant 0 : i32
    %c0_i32_0 = arith.constant 0 : i32
    return %arg0, %c0_i32 : i32, i32
  }
  func.func @transform_4(%arg0: i32) -> (i32, i32, i32) {
    %c0_i32 = arith.constant 0 : i32
    %c0_i32_0 = arith.constant 0 : i32
    %c0_i32_1 = arith.constant 0 : i32
    return %arg0, %c0_i32, %c0_i32_0 : i32, i32, i32
  }
}

</mosaic_0001>

<bundles_post_ra>
// kernel: tpu_custom_call.1
= control target key start
LH: loop header
LB: loop body
LE: loop exit
PB: predicated region body
PF: predicated region fallthrough
CT: control target
= control target key end

     0   :  { %10 = vsyncpa [#allocation3], 0  ;;  %s399_s0 = inlined_call_operand.hbm [shape: f32[8,16], index: 0, kind: input, shape index: {}]   ;;  %s400_s1 = inlined_call_operand.hbm [shape: f32[16,128], index: 1, kind: input, shape index: {}]   ;;  %s401_s2 = inlined_call_operand.vmem [shape: f32[1,128], index: 2, kind: input, shape index: {}]   ;;  %s402_s3 = inlined_call_operand.hbm [shape: f32[8,128], index: 3, kind: output, shape index: {0}]   ;;  %s403_s4 = inlined_call_operand.hbm [shape: f32[1,2,128], index: 4, kind: output, shape index: {1}]  }
   0x1   :  { %11 = vsyncpa [#allocation6], 0 }
   0x2   :  { %12 = vsyncpa [#allocation4], 0 }
   0x3   :  { %13 = vsyncpa [#allocation9], 0  ;;  %s307_s15 = smov [#allocation2]   ;;  %s308_s17 = smov [#allocation5]  }
   0x4   :  { %s20_s16 = sshll.u32 %s307_s15, 4  ;;  %s29_s18 = sshll.u32 %s308_s17, 4  ;;  %s21_s16 = int_to_ptr.vmem [resolvable:$true] %s20_s16  ;;  %s341_s18 = int_to_ptr.vmem [resolvable:$true] %s29_s18 }
   0x5   :  { %s211_s21 = scalar_lea.hbm %s399_s0, 128 }
   0x6   :  { %p212_p0 = scmp.ne.s32.totalorder %s399_s0, %s211_s21  ;;  %p215_p1 = scmp.lt.u32.totalorder %s211_s21, %s399_s0 }
   0x8   :  { %p217_p2 = pnand %p215_p1, %p212_p0 }
   0xa   :  { %220 = shalt.err (!%p217_p2)
}
   0xb   :  { %s221_s26 = scalar_lea.vmem %s21_s16, 128  ;;  %p226_p4 = scmp.lt.s32.totalorder %s21_s16, %s21_s16 }
   0xc   :  { %p222_p3 = scmp.ne.s32.totalorder %s21_s16, %s221_s26  ;;  %p227_p5 = scmp.lt.s32.totalorder %s221_s26, %s221_s26 }
   0xe   :  { %p228_p6 = por %p227_p5, %p226_p4 }
  0x10   :  { %p229_p7 = pnand %p228_p6, %p222_p3 }
  0x12   :  { %232 = shalt.err (!%p229_p7)
}
  0x13   :  { %23 = dma.hbm_to_vmem [thread:$0]  %s399_s0, 128, %s21_s16, [#allocation3]  }
  0x14   :  { %s233_s5 = scalar_lea.hbm %s400_s1, 256 }
  0x15   :  { %p234_p8 = scmp.ne.s32.totalorder %s400_s1, %s233_s5  ;;  %p237_p9 = scmp.lt.u32.totalorder %s233_s5, %s400_s1 }
  0x17   :  { %p239_p10 = pnand %p237_p9, %p234_p8 }
  0x19   :  { %242 = shalt.err (!%p239_p10)
}
  0x1a   :  { %s243_s10 = scalar_lea.vmem %s341_s18, 256  ;;  %p248_p12 = scmp.lt.s32.totalorder %s341_s18, %s341_s18 }
  0x1b   :  { %p244_p11 = scmp.ne.s32.totalorder %s341_s18, %s243_s10  ;;  %p249_p13 = scmp.lt.s32.totalorder %s243_s10, %s243_s10 }
  0x1d   :  { %p250_p0 = por %p249_p13, %p248_p12 }
  0x1f   :  { %p251_p1 = pnand %p250_p0, %p244_p11 }
  0x21   :  { %254 = shalt.err (!%p251_p1)
}
  0x22   :  { %s309_s0 = smov 128   ;;  %s310_s11 = smov 8  }
  0x23   :  { %35 = dma.hbm_to_vmem [thread:$0]  %s400_s1, 256, %s341_s18, [#allocation6], %s309_s0, %s309_s0, %s310_s11  }
  0x24   :  { %299 = dma.done.wait [#allocation3], 128  }
  0x25   :  { %300 = vsyncadd [#allocation3], 4294967168 }
  0x26   :  { %301 = dma.done.wait [#allocation6], 256  }
  0x27   :  { %302 = vsyncadd [#allocation6], 4294967040  ;;  %v311_v0 = vmov 0.0|0.0   ;;  %vm312_vm0 = vmmov 0   ;;  %v313_v1 = vmov 0.0   ;;  %v45_v2 = vld [vmem:[#allocation5] sm:$0xff] }
  0x28   :  { %197 = vmatprep.subr.bf16.mxu0 %v311_v0  ;;  %194 = vmatprep.mubr.msk.f32.mxu0 %vm312_vm0, %v313_v1  ;;  %v46_v3 = vld [vmem:[#allocation5 + $0x8] sm:$0xff]  ;;  %v44_v5 = vld [vmem:[#allocation2] sm:$0xff]  ;;  %vm54_vm1 = vcmask 130048   ;;  %s314_s1 = smov [#allocation7]  }
  0x29   :  { %v198_v4 = vpack.c.bf16 %v46_v3, %v45_v2  ;;  %v185_v6 = vld [vmem:[%s401_s2] ss:$0 sm:$0xff]  ;;  %s161_s16 = sshll.u32 %s314_s1, 4  ;;  %s162_s16 = int_to_ptr.vmem [resolvable:$true] %s161_s16 }
  0x2a   :  { %s255_s17 = scalar_lea.vmem %s162_s16, 128  ;;  %p260_p3 = scmp.lt.s32.totalorder %s162_s16, %s162_s16 }
  0x2b   :  { %199 = vmatpush3.bf16.msra.mxu0 %v198_v4  ;;  %p256_p2 = scmp.ne.s32.totalorder %s162_s16, %s255_s17  ;;  %p261_p4 = scmp.lt.s32.totalorder %s255_s17, %s255_s17 }
  0x2d   :  { %p262_p5 = por %p261_p4, %p260_p3 }
  0x2e   :  { %195 = vmatmul.mubr.msk.f32.vlgmr.msra.gmra.mrb[0].mxu0 %vm54_vm1, %v44_v5 }
  0x2f   :  { %p263_p6 = pnand %p262_p5, %p256_p2 }
 0x101   :  { %v124_v7 = vpop.f32.mrb[0].mxu0 }
 0x102   :  { %v125_v8 = vadd.f32 %v185_v6, %v124_v7  ;;  %v196_v9 = vpop.f32.mrb[1].mxu0 }
 0x104   :  { %209 = vtanh.f32 %v125_v8 }
 0x10e   :  { %v210_v10 = vpop.eup %209 }
 0x10f   :  { %154 = vst [vmem:[#allocation7] sm:$0xff] %v210_v10  ;;  %v138_v11 = vrot.slane %v210_v10, 4  ;;  %v144_v12 = vmul.f32 %v210_v10, %v210_v10 }
 0x110   :  { %266 = shalt.err (!%p263_p6)
}
 0x111   :  { %s267_s19 = scalar_lea.hbm %s402_s3, 128 }
 0x112   :  { %p268_p7 = scmp.ne.s32.totalorder %s402_s3, %s267_s19  ;;  %p271_p8 = scmp.lt.u32.totalorder %s267_s19, %s402_s3 }
 0x114   :  { %p273_p9 = pnand %p271_p8, %p268_p7 }
 0x116   :  { %276 = shalt.err (!%p273_p9)
}
 0x117   :  { %164 = dma.vmem_to_hbm [thread:$0]  %s162_s16, 128, %s402_s3, [#allocation4]   ;;  %v139_v13 = vadd.f32 %v210_v10, %v138_v11  ;;  %v145_v14 = vrot.slane %v144_v12, 4  ;;  %vm151_vm2 = vcmask 1040384  }
 0x118   :  { %s315_s26 = smov [#allocation8]  }
 0x119   :  { %v140_v15 = vrot.slane %v139_v13, 2  ;;  %v146_v16 = vadd.f32 %v145_v14, %v144_v12  ;;  %s171_s27 = sshll.u32 %s315_s26, 4  ;;  %s172_s27 = int_to_ptr.vmem [resolvable:$true] %s171_s27 }
 0x11a   :  { %s277_s28 = scalar_lea.vmem %s172_s27, 32  ;;  %p282_p11 = scmp.lt.s32.totalorder %s172_s27, %s172_s27 }
 0x11b   :  { %v141_v17 = vadd.f32 %v140_v15, %v139_v13  ;;  %v147_v18 = vrot.slane %v146_v16, 2  ;;  %p278_p10 = scmp.ne.s32.totalorder %s172_s27, %s277_s28  ;;  %p283_p12 = scmp.lt.s32.totalorder %s277_s28, %s277_s28 }
 0x11d   :  { %v142_v19 = vrot.slane %v141_v17, 1  ;;  %v148_v20 = vadd.f32 %v147_v18, %v146_v16  ;;  %p284_p13 = por %p283_p12, %p282_p11 }
 0x11f   :  { %v149_v21 = vrot.slane %v148_v20, 1  ;;  %v143_v22 = vadd.f32 %v142_v19, %v141_v17  ;;  %p285_p0 = pnand %p284_p13, %p278_p10 }
 0x121   :  { %v150_v23 = vadd.f32 %v149_v21, %v148_v20 }
 0x123   :  { %v152_v24 = vsel %vm151_vm2, %v143_v22, %v150_v23 }
 0x124   :  { %153 = vst [vmem:[#allocation8] sm:$0x3] %v152_v24 }
 0x125   :  { %288 = shalt.err (!%p285_p0)
}
 0x126   :  { %s289_s30 = scalar_lea.hbm %s403_s4, 32 }
 0x127   :  { %p290_p1 = scmp.ne.s32.totalorder %s403_s4, %s289_s30  ;;  %p293_p2 = scmp.lt.u32.totalorder %s289_s30, %s403_s4 }
 0x129   :  { %p295_p3 = pnand %p293_p2, %p290_p1 }
 0x12b   :  { %298 = shalt.err (!%p295_p3)
}
 0x12c   :  { %174 = dma.vmem_to_hbm [thread:$0]  %s172_s27, 32, %s403_s4, [#allocation9]  }
 0x12d   :  { %303 = dma.done.wait [#allocation4], 128  }
 0x12e   :  { %304 = vsyncadd [#allocation4], 4294967168 }
 0x12f   :  { %305 = dma.done.wait [#allocation9], 32  }
 0x130   :  { %306 = vsyncadd [#allocation9], 4294967264 }
 0x131   :  { %181 = vsyncpa [#allocation3], 1 }
 0x132   :  { %182 = vsyncpa [#allocation6], 1 }
 0x133   :  { %183 = vsyncpa [#allocation4], 1 }
 0x134   :  { %184 = vsyncpa [#allocation9], 1 }

</bundles_post_ra>
